<compile_context>
chip_gen: v7x
topology: tpu7x:2x2x1
jax: 0.10.0
libtpu: 0.0.40
codegen_flags: <defaults>
</compile_context>

<pallas_src>
import functools

import jax
import jax.numpy as jnp
from jax.experimental import pallas as pl
from jax.experimental.pallas import tpu as pltpu


def _build_pe_table(num_hiddens: int, max_len: int, dtype=jnp.float32) -> jnp.ndarray:
    """Sin/cos table, shape (max_len, num_hiddens).  Matches the torch init.

    (Like the torch code, assumes even num_hiddens.)
    """
    pos = jnp.arange(max_len, dtype=jnp.float32)[:, None]                      # (max_len, 1)
    div = jnp.power(
        10000.0, jnp.arange(0, num_hiddens, 2, dtype=jnp.float32) / num_hiddens
    )                                                                          # (H//2,)
    ang = pos / div                                                            # (max_len, H//2)
    p = jnp.zeros((max_len, num_hiddens), dtype=jnp.float32)
    p = p.at[:, 0::2].set(jnp.sin(ang))
    p = p.at[:, 1::2].set(jnp.cos(ang))
    return p.astype(dtype)


# ----------------------------- kernels ------------------------------------ #

def _pe_add_kernel(x_ref, p_ref, o_ref):
    # x_ref: (TB, TC), p_ref: (1, TC) -> broadcast over the batch rows.
    o_ref[...] = x_ref[...] + p_ref[...]


def _pe_dropout_kernel(x_ref, p_ref, bits_ref, o_ref, *, threshold: int, scale: float):
    y = x_ref[...] + p_ref[...]
    # Inverted dropout: drop iff bits < threshold  (P[drop] = threshold / 2^32).
    keep = bits_ref[...] >= jnp.uint32(threshold)
    o_ref[...] = jnp.where(keep, y * jnp.asarray(scale, y.dtype), jnp.zeros_like(y))


# ----------------------------- wrapper ------------------------------------ #

def positional_encoding(
    x: jnp.ndarray,
    p_flat: jnp.ndarray,
    *,
    dropout_p: float = 0.0,
    training: bool = False,
    rng: jax.Array | None = None,
) -> jnp.ndarray:
    """x: (B, L, H); p_flat: flattened (max_len*H,) positional table in x.dtype."""
    B, L, H = x.shape
    N = L * H
    x2 = x.reshape(B, N)  # contiguous reshape -> free

    # Row (batch) tile: full batch if small, else 8-row tiles (sublane aligned).
    TB = B if B <= 8 else 8

    # Column tile: lane-dense, ~1 MiB of f32 per x block.
    if N % 128 == 0:
        # No slice needed: the flattened table's first N columns are exactly
        # positions [0, L), so the BlockSpec selects them directly.
        p2 = p_flat.reshape(1, -1)                       # (1, max_len*H)
        col_cap = max(128, ((1 << 20) // (4 * TB)) // 128 * 128)
        TC = min(N, col_cap)
    else:
        # Fallback for non-lane-aligned N: one full-width column block.
        p2 = p_flat[:N].reshape(1, N)
        TC = N

    grid = (pl.cdiv(N, TC), pl.cdiv(B, TB))              # (cols outer, rows inner)

    x_spec = pl.BlockSpec((TB, TC), lambda c, r: (r, c))
    p_spec = pl.BlockSpec((1, TC), lambda c, r: (0, c))  # const over inner axis -> DMA reused
    o_spec = pl.BlockSpec((TB, TC), lambda c, r: (r, c))

    compiler_params = pltpu.CompilerParams(
        dimension_semantics=("parallel", "parallel"),
    )

    if training and dropout_p > 0.0:
        if rng is None:
            rng = jax.random.PRNGKey(0)
        bits = jax.random.bits(rng, (B, N), dtype=jnp.uint32)
        threshold = min(int(round(dropout_p * (1 << 32))), (1 << 32) - 1)
        scale = 1.0 / (1.0 - dropout_p)
        kernel = functools.partial(_pe_dropout_kernel, threshold=threshold, scale=scale)
        out2 = pl.pallas_call(
            kernel,
            out_shape=jax.ShapeDtypeStruct((B, N), x.dtype),
            grid=grid,
            in_specs=[x_spec, p_spec, x_spec],
            out_specs=o_spec,
            compiler_params=compiler_params,
        )(x2, p2, bits)
    else:
        out2 = pl.pallas_call(
            _pe_add_kernel,
            out_shape=jax.ShapeDtypeStruct((B, N), x.dtype),
            grid=grid,
            in_specs=[x_spec, p_spec],
            out_specs=o_spec,
            compiler_params=compiler_params,
        )(x2, p2)

    return out2.reshape(B, L, H)


# ------------------------------ demo --------------------------------------- #

if __name__ == "__main__":
    # small shapes consistent with the module: batch=2, seq=8, hidden=32
    B, L, H = 2, 8, 32
    max_len = 1000
    dropout_p = 0.1

    key = jax.random.PRNGKey(0)
    kx, kd = jax.random.split(key)
    x = jax.random.normal(kx, (B, L, H), dtype=jnp.float32)

    p_table = _build_pe_table(H, max_len, dtype=x.dtype)  # (max_len, H)
    p_flat = p_table.reshape(-1)                          # (max_len*H,)

    # eval mode (dropout = identity) -> exact semantics, check vs reference
    out_eval = positional_encoding(x, p_flat, dropout_p=dropout_p, training=False)
    out_eval = jax.block_until_ready(out_eval)
    ref = x + p_table[None, :L, :]
    assert jnp.allclose(out_eval, ref, atol=1e-6, rtol=1e-6), "eval-mode mismatch"

    # training mode (exercises the in-kernel dropout path)
    out_train = positional_encoding(
        x, p_flat, dropout_p=dropout_p, training=True, rng=kd
    )
    out_train = jax.block_until_ready(out_train)
    assert out_train.shape == (B, L, H)
    # every element is either dropped (0) or (x + P) scaled by 1/(1-p)
    scaled = ref / (1.0 - dropout_p)
    ok = jnp.isclose(out_train, scaled, atol=1e-5, rtol=1e-5) | (out_train == 0.0)
    assert bool(jnp.all(ok)), "train-mode dropout structure mismatch"

    print("KERNEL_OK")
</pallas_src>

<mosaic_0001>
module attributes {stable_mosaic.version = 11 : i64} {
  func.func @_pe_add_kernel(%arg0: i32, %arg1: i32, %arg2: memref<2x256xf32, #tpu.memory_space<vmem>>, %arg3: memref<1x256xf32, #tpu.memory_space<vmem>>, %arg4: memref<2x256xf32, #tpu.memory_space<vmem>>) attributes {dimension_semantics = [#tpu.dimension_semantics<parallel>, #tpu.dimension_semantics<parallel>], iteration_bounds = array<i64: 1, 1>, scalar_prefetch = 0 : i64, scratch_operands = 0 : i64, tpu.core_type = #tpu.core_type<tc>, window_params = [{transform_indices = @transform_0, window_bounds = array<i64: 2, 256>}, {transform_indices = @transform_1, window_bounds = array<i64: 1, 256>}, {transform_indices = @transform_2, window_bounds = array<i64: 2, 256>}]} {
    %c0 = arith.constant 0 : index
    %c0_0 = arith.constant 0 : index
    %0 = vector.load %arg2[%c0, %c0_0] : memref<2x256xf32, #tpu.memory_space<vmem>>, vector<2x256xf32>
    %c0_1 = arith.constant 0 : index
    %c0_2 = arith.constant 0 : index
    %1 = vector.load %arg3[%c0_1, %c0_2] : memref<1x256xf32, #tpu.memory_space<vmem>>, vector<1x256xf32>
    %2 = vector.broadcast %1 : vector<1x256xf32> to vector<2x256xf32>
    %3 = arith.addf %0, %2 : vector<2x256xf32>
    %c0_3 = arith.constant 0 : index
    %c0_4 = arith.constant 0 : index
    %4 = vector.load %arg4[%c0_3, %c0_4] : memref<2x256xf32, #tpu.memory_space<vmem>>, vector<2x256xf32>
    tpu.vector_store %arg4[%c0_3, %c0_4], %3 {strides = array<i32>} : memref<2x256xf32, #tpu.memory_space<vmem>>, vector<2x256xf32>,
    return
  }
  func.func @transform_0(%arg0: i32, %arg1: i32) -> (i32, i32) {
    %c0_i32 = arith.constant 0 : i32
    return %arg1, %arg0 : i32, i32
  }
  func.func @transform_1(%arg0: i32, %arg1: i32) -> (i32, i32) {
    %c0_i32 = arith.constant 0 : i32
    %c0_i32_0 = arith.constant 0 : i32
    return %c0_i32, %arg0 : i32, i32
  }
  func.func @transform_2(%arg0: i32, %arg1: i32) -> (i32, i32) {
    %c0_i32 = arith.constant 0 : i32
    return %arg1, %arg0 : i32, i32
  }
}

</mosaic_0001>

<bundles_post_ra>
// kernel: tpu_custom_call.1
= control target key start
LH: loop header
LB: loop body
LE: loop exit
PB: predicated region body
PF: predicated region fallthrough
CT: control target
= control target key end

     0   :  { %7 = vsyncpa [#allocation3], 0  ;;  %s215_s0 = inlined_call_operand.hbm [shape: f32[2,256], index: 0, kind: input, shape index: {}]   ;;  %s216_s1 = inlined_call_operand.hbm [shape: f32[1,32000], index: 1, kind: input, shape index: {}]   ;;  %s217_s2 = inlined_call_operand.hbm [shape: f32[2,256], index: 2, kind: output, shape index: {}]  }
   0x1   :  { %8 = vsyncpa [#allocation6], 0 }
   0x2   :  { %9 = vsyncpa [#allocation4], 0  ;;  %s150_s9 = smov [#allocation2]   ;;  %s151_s11 = smov [#allocation5]  }
   0x3   :  { %s16_s10 = sshll.u32 %s150_s9, 4  ;;  %s26_s12 = sshll.u32 %s151_s11, 4  ;;  %s17_s10 = int_to_ptr.vmem [resolvable:$true] %s16_s10  ;;  %s169_s12 = int_to_ptr.vmem [resolvable:$true] %s26_s12 }
   0x4   :  { %s78_s15 = scalar_lea.hbm %s215_s0, 64 }
   0x5   :  { %p79_p0 = scmp.ne.s32.totalorder %s215_s0, %s78_s15  ;;  %p82_p1 = scmp.lt.u32.totalorder %s78_s15, %s215_s0 }
   0x7   :  { %p84_p2 = pnand %p82_p1, %p79_p0 }
   0x9   :  { %87 = shalt.err (!%p84_p2)
}
   0xa   :  { %s88_s20 = scalar_lea.vmem %s17_s10, 64  ;;  %p93_p4 = scmp.lt.s32.totalorder %s17_s10, %s17_s10 }
   0xb   :  { %p89_p3 = scmp.ne.s32.totalorder %s17_s10, %s88_s20  ;;  %p94_p5 = scmp.lt.s32.totalorder %s88_s20, %s88_s20 }
   0xd   :  { %p95_p6 = por %p94_p5, %p93_p4 }
   0xf   :  { %p96_p7 = pnand %p95_p6, %p89_p3 }
  0x11   :  { %99 = shalt.err (!%p96_p7)
}
  0x12   :  { %19 = dma.hbm_to_vmem [thread:$0]  %s215_s0, 64, %s17_s10, [#allocation3]  }
  0x13   :  { %s100_s25 = scalar_lea.hbm %s216_s1, 32  ;;  %s102_s30 = scalar_lea.hbm %s216_s1, 4000 }
  0x14   :  { %p101_p8 = scmp.ne.s32.totalorder %s216_s1, %s100_s25  ;;  %p103_p9 = scmp.lt.u32.totalorder %s102_s30, %s100_s25 }
  0x15   :  { %p104_p10 = scmp.lt.u32.totalorder %s100_s25, %s216_s1 }
  0x17   :  { %p105_p11 = por %p104_p10, %p103_p9 }
  0x19   :  { %p106_p12 = pnand %p105_p11, %p101_p8 }
  0x1b   :  { %109 = shalt.err (!%p106_p12)
}
  0x1c   :  { %s110_s0 = scalar_lea.vmem %s169_s12, 32  ;;  %p115_p0 = scmp.lt.s32.totalorder %s169_s12, %s169_s12 }
  0x1d   :  { %p111_p13 = scmp.ne.s32.totalorder %s169_s12, %s110_s0  ;;  %p116_p1 = scmp.lt.s32.totalorder %s110_s0, %s110_s0 }
  0x1f   :  { %p117_p2 = por %p116_p1, %p115_p0 }
  0x21   :  { %p118_p3 = pnand %p117_p2, %p111_p13 }
  0x23   :  { %121 = shalt.err (!%p118_p3)
}
  0x24   :  { %29 = dma.hbm_to_vmem [thread:$0]  %s216_s1, 32, %s169_s12, [#allocation6]  }
  0x25   :  { %144 = dma.done.wait [#allocation3], 64  }
  0x26   :  { %145 = vsyncadd [#allocation3], 4294967232 }
  0x27   :  { %146 = dma.done.wait [#allocation6], 32  }
  0x28   :  { %147 = vsyncadd [#allocation6], 4294967264  ;;  %v39_v0 = vlaneseq  ;;  %v152_v1 = vmov 1983009808   ;;  %v37_v7 = vld [vmem:[#allocation5] sm:$0x3] }
  0x29   :  { %v49_v2 = vunpack.c.l.s4 %v152_v1  ;;  %v36_v12 = vld [vmem:[#allocation2] sm:$0xf]  ;;  %s153_s7 = smov [#allocation7]  }
  0x2a   :  { %v40_v3 = vshrl.u32 %v39_v0, 7  ;;  %s64_s8 = sshll.u32 %s153_s7, 4  ;;  %s65_s8 = int_to_ptr.vmem [resolvable:$true] %s64_s8 }
  0x2b   :  { %v50_v6 = vunpack.c.0.s8 %v49_v2  ;;  %s122_s1 = scalar_lea.vmem %s65_s8, 64  ;;  %p127_p5 = scmp.lt.s32.totalorder %s65_s8, %s65_s8 }
  0x2c   :  { %v41_v4 = vsub.s32 0, %v40_v3  ;;  %v45_v5 = vsub.s32 1, %v40_v3  ;;  %p123_p4 = scmp.ne.s32.totalorder %s65_s8, %s122_s1  ;;  %p128_p6 = scmp.lt.s32.totalorder %s122_s1, %s122_s1 }
  0x2d   :  { %v53_v10 = vsub.s32 %v50_v6, %v40_v3 }
  0x2e   :  { %v42_v8 = vrot.slane %v37_v7, %v41_v4  ;;  %v46_v9 = vrot.slane %v37_v7, %v45_v5  ;;  %p129_p7 = por %p128_p6, %p127_p5 }
  0x30   :  { %v47_v11 = vcombine.low %v42_v8, %v46_v9  ;;  %p130_p8 = pnand %p129_p7, %p123_p4 }
  0x32   :  { %v54_v13 = vrot.slane %v47_v11, %v53_v10 }
  0x34   :  { %v56_v14 = vadd.f32 %v54_v13, %v36_v12 }
  0x36   :  { %57 = vst [vmem:[#allocation7] sm:$0xf] %v56_v14 }
  0x37   :  { %133 = shalt.err (!%p130_p8)
}
  0x38   :  { %s134_s11 = scalar_lea.hbm %s217_s2, 64 }
  0x39   :  { %p135_p9 = scmp.ne.s32.totalorder %s217_s2, %s134_s11  ;;  %p138_p10 = scmp.lt.u32.totalorder %s134_s11, %s217_s2 }
  0x3b   :  { %p140_p11 = pnand %p138_p10, %p135_p9 }
  0x3d   :  { %143 = shalt.err (!%p140_p11)
}
  0x3e   :  { %67 = dma.vmem_to_hbm [thread:$0]  %s65_s8, 64, %s217_s2, [#allocation4]  }
  0x3f   :  { %148 = dma.done.wait [#allocation4], 64  }
  0x40   :  { %149 = vsyncadd [#allocation4], 4294967232 }
  0x41   :  { %71 = vsyncpa [#allocation3], 1 }
  0x42   :  { %72 = vsyncpa [#allocation6], 1 }
  0x43   :  { %73 = vsyncpa [#allocation4], 1 }

</bundles_post_ra>
